<compile_context>
chip_gen: v6e
topology: v6e:2x2x1
jax: 0.10.0
libtpu: 0.0.40
codegen_flags: <defaults>
</compile_context>

<pallas_src>
import jax
import jax.numpy as jnp
from jax.experimental import pallas as pl
from jax.experimental.pallas import tpu as pltpu

_LANE = 128            # last block dim must be a multiple of 128
_SUBLANE = 8           # second-to-last block dim must be a multiple of 8 (f32)
_MAX_TILE_ROWS = 4096  # (4096, 128) f32 = 2 MiB per buffer


def _round_up(a: int, b: int) -> int:
    return ((a + b - 1) // b) * b


def _logreg_kernel(w_ref, b_ref, x_ref, o_ref):
    # Scalar weight / bias live in SMEM; broadcast over the (tile_r, 128) slab.
    w = w_ref[0, 0]
    b = b_ref[0, 0]
    z = x_ref[...] * w + b                       # VPU broadcast FMA
    # Exact sigmoid with a single EUP op: sigmoid(z) = 0.5 * tanh(z/2) + 0.5
    o_ref[...] = 0.5 * jnp.tanh(0.5 * z) + 0.5


def logistic_regression(x, weight, bias, *, force_kernel=False,
                        min_kernel_elems=1 << 16):
    """x: (N, 1) f32, weight: (1, 1), bias: (1,) -> sigmoid(x @ W.T + b), (N, 1)."""
    n = x.shape[0]
    w_scalar = weight.reshape(()).astype(jnp.float32)
    b_scalar = bias.reshape(()).astype(jnp.float32)

    # Small-N fast path: XLA's fused elementwise is already at roofline and
    # avoids pallas_call launch + repack overhead for tiny batches.
    if not force_kernel and n < min_kernel_elems:
        z = x.astype(jnp.float32) * w_scalar + b_scalar
        return jax.nn.sigmoid(z).reshape(n, 1)

    w2 = w_scalar.reshape(1, 1)
    b2 = b_scalar.reshape(1, 1)

    # Lane-dense repack: pad to a multiple of 8 rows only (not to a tile
    # multiple); Pallas handles the ragged last block.
    rows_needed = pl.cdiv(max(n, 1), _LANE)
    rows = _round_up(rows_needed, _SUBLANE)
    # Keep the parallel grid >= 2 steps when possible (v7x megacore), capped
    # at 4096 rows/tile (2 MiB buffers -> 8 MiB double-buffered, fits v5e).
    tile_r = min(_MAX_TILE_ROWS, max(_SUBLANE, _round_up(pl.cdiv(rows, 2), _SUBLANE)))
    grid = (pl.cdiv(rows, tile_r),)
    padded = rows * _LANE

    xf = x.reshape(-1).astype(jnp.float32)
    xf = jnp.pad(xf, (0, padded - n))
    x2 = xf.reshape(rows, _LANE)

    out = pl.pallas_call(
        _logreg_kernel,
        out_shape=jax.ShapeDtypeStruct((rows, _LANE), jnp.float32),
        grid=grid,
        in_specs=[
            pl.BlockSpec(memory_space=pltpu.SMEM),            # weight scalar
            pl.BlockSpec(memory_space=pltpu.SMEM),            # bias scalar
            pl.BlockSpec((tile_r, _LANE), lambda i: (i, 0)),  # x row tile
        ],
        out_specs=pl.BlockSpec((tile_r, _LANE), lambda i: (i, 0)),
        compiler_params=pltpu.CompilerParams(
            dimension_semantics=("parallel",),
            allow_input_fusion=[2],   # fuse the pad/reshape repack into input DMA
        ),
    )(w2, b2, x2)

    # Drop the padded tail.
    return out.reshape(-1)[:n].reshape(n, 1)


if __name__ == "__main__":
    key = jax.random.PRNGKey(0)
    kx, kw, kb, kx2 = jax.random.split(key, 4)

    # torch.nn.Linear(1, 1) parameter shapes: W (1, 1), b (1,)
    weight = jax.random.uniform(kw, (1, 1), jnp.float32, -1.0, 1.0)
    bias = jax.random.uniform(kb, (1,), jnp.float32, -1.0, 1.0)

    # Jit the whole wrapper so pad/reshape/slice fuse around the kernel.
    run = jax.jit(logistic_regression, static_argnames=("force_kernel",))

    # Small batch, shape (8, 1) like the PyTorch module's x; force kernel path.
    x_small = jax.random.normal(kx, (8, 1), jnp.float32)
    out_small = jax.block_until_ready(run(x_small, weight, bias, force_kernel=True))
    ref_small = jax.nn.sigmoid(x_small @ weight.T + bias)
    assert out_small.shape == (8, 1)
    assert jnp.allclose(out_small, ref_small, atol=1e-5, rtol=1e-5), (
        out_small, ref_small)

    # Ragged batch to exercise the lane-dense padding + ragged-block path.
    x_big = jax.random.normal(kx2, (1000, 1), jnp.float32)
    out_big = jax.block_until_ready(run(x_big, weight, bias, force_kernel=True))
    ref_big = jax.nn.sigmoid(x_big @ weight.T + bias)
    assert out_big.shape == (1000, 1)
    assert jnp.allclose(out_big, ref_big, atol=1e-5, rtol=1e-5), (out_big, ref_big)

    # Auto-dispatch (small-N fast path) agrees with the kernel path.
    out_fast = jax.block_until_ready(run(x_big, weight, bias))
    assert jnp.allclose(out_fast, ref_big, atol=1e-5, rtol=1e-5)

    print("KERNEL_OK")
</pallas_src>

<mosaic_0001>
module attributes {stable_mosaic.version = 11 : i64} {
  func.func @_logreg_kernel(%arg0: i32, %arg1: memref<1x1xf32, #tpu.memory_space<smem>>, %arg2: memref<1x1xf32, #tpu.memory_space<smem>>, %arg3: memref<8x128xf32, #tpu.memory_space<vmem>>, %arg4: memref<8x128xf32, #tpu.memory_space<vmem>>) attributes {dimension_semantics = [#tpu.dimension_semantics<parallel>], iteration_bounds = array<i64: 1>, scalar_prefetch = 0 : i64, scratch_operands = 0 : i64, tpu.core_type = #tpu.core_type<tc>, window_params = [{transform_indices = @transform_0, window_bounds = array<i64: 1, 1>}, {transform_indices = @transform_1, window_bounds = array<i64: 1, 1>}, {transform_indices = @transform_2, window_bounds = array<i64: 8, 128>}, {transform_indices = @transform_3, window_bounds = array<i64: 8, 128>}]} {
    %c0 = arith.constant 0 : index
    %c0_0 = arith.constant 0 : index
    %0 = memref.load %arg1[%c0, %c0_0] : memref<1x1xf32, #tpu.memory_space<smem>>
    %c0_1 = arith.constant 0 : index
    %c0_2 = arith.constant 0 : index
    %1 = memref.load %arg2[%c0_1, %c0_2] : memref<1x1xf32, #tpu.memory_space<smem>>
    %c0_3 = arith.constant 0 : index
    %c0_4 = arith.constant 0 : index
    %2 = vector.load %arg3[%c0_3, %c0_4] : memref<8x128xf32, #tpu.memory_space<vmem>>, vector<8x128xf32>
    %3 = vector.broadcast %0 : f32 to vector<8x128xf32>
    %4 = arith.mulf %2, %3 : vector<8x128xf32>
    %5 = vector.broadcast %1 : f32 to vector<8x128xf32>
    %6 = arith.addf %4, %5 : vector<8x128xf32>
    %cst = arith.constant 5.000000e-01 : f32
    %7 = vector.broadcast %cst : f32 to vector<8x128xf32>
    %8 = arith.mulf %7, %6 : vector<8x128xf32>
    %9 = math.tanh %8 : vector<8x128xf32>
    %cst_5 = arith.constant 5.000000e-01 : f32
    %10 = vector.broadcast %cst_5 : f32 to vector<8x128xf32>
    %11 = arith.mulf %10, %9 : vector<8x128xf32>
    %cst_6 = arith.constant 5.000000e-01 : f32
    %12 = vector.broadcast %cst_6 : f32 to vector<8x128xf32>
    %13 = arith.addf %11, %12 : vector<8x128xf32>
    %c0_7 = arith.constant 0 : index
    %c0_8 = arith.constant 0 : index
    %14 = vector.load %arg4[%c0_7, %c0_8] : memref<8x128xf32, #tpu.memory_space<vmem>>, vector<8x128xf32>
    tpu.vector_store %arg4[%c0_7, %c0_8], %13 {strides = array<i32>} : memref<8x128xf32, #tpu.memory_space<vmem>>, vector<8x128xf32>,
    return
  }
  func.func @transform_0(%arg0: i32) -> (i32, i32) {
    %c0_i32 = arith.constant 0 : i32
    %c0_i32_0 = arith.constant 0 : i32
    %c0_i32_1 = arith.constant 0 : i32
    return %c0_i32, %c0_i32_0 : i32, i32
  }
  func.func @transform_1(%arg0: i32) -> (i32, i32) {
    %c0_i32 = arith.constant 0 : i32
    %c0_i32_0 = arith.constant 0 : i32
    %c0_i32_1 = arith.constant 0 : i32
    return %c0_i32, %c0_i32_0 : i32, i32
  }
  func.func @transform_2(%arg0: i32) -> (i32, i32) {
    %c0_i32 = arith.constant 0 : i32
    %c0_i32_0 = arith.constant 0 : i32
    return %arg0, %c0_i32 : i32, i32
  }
  func.func @transform_3(%arg0: i32) -> (i32, i32) {
    %c0_i32 = arith.constant 0 : i32
    %c0_i32_0 = arith.constant 0 : i32
    return %arg0, %c0_i32 : i32, i32
  }
}

</mosaic_0001>

<bundles_post_ra>
// kernel: logistic_regression.1
= control target key start
LH: loop header
LB: loop body
LE: loop exit
PB: predicated region body
PF: predicated region fallthrough
CT: control target
= control target key end

     0   :  { %s66_s0 = inlined_call_operand.<no memory space> [shape: f32[1,1], index: 0, kind: input, shape index: {}]   ;;  %s67_s1 = inlined_call_operand.<no memory space> [shape: f32[1,1], index: 1, kind: input, shape index: {}]   ;;  %s68_s2 = inlined_call_operand.vmem [shape: f32[8,128], index: 2, kind: input, shape index: {}]   ;;  %s69_s3 = inlined_call_operand.vmem [shape: f32[8,128], index: 3, kind: output, shape index: {}]  }
   0x1   :  { %v18_v0 = vld [vmem:[%s68_s2] sm:$0xff]  ;;  %v19_v1 = vstv %s66_s0  ;;  %v21_v2 = vstv %s67_s1 }
   0x2   :  { %v20_v3 = vmul.f32 %v19_v1, %v18_v0 }
   0x4   :  { %v22_v4 = vadd.f32 %v21_v2, %v20_v3 }
   0x6   :  { %v23_v5 = vmul.f32 0.5, %v22_v4 }
   0x8   :  { %32 = vtanh.f32 %v23_v5 }
  0x15   :  { %v33_v6 = vpop.eup %32 }
  0x16   :  { %v25_v7 = vmul.f32 0.5, %v33_v6 }
  0x18   :  { %v26_v8 = vadd.f32 0.5, %v25_v7 }
  0x1a   :  { %27 = vst [vmem:[%s69_s3] sm:$0xff] %v26_v8 }

</bundles_post_ra>
